<compile_context>
chip_gen: v7x
topology: tpu7x:2x2x1
jax: 0.10.0
libtpu: 0.0.40
codegen_flags: <defaults>
</compile_context>

<pallas_src>
import functools

import jax
import jax.numpy as jnp
from jax.experimental import pallas as pl
from jax.experimental.pallas import tpu as pltpu

_LANE = 128      # lane width: last dim of every block should be a multiple of this
_SUBLANE = 8     # sublane width: second-to-last dim multiple


def _round_up(n: int, m: int) -> int:
    return ((n + m - 1) // m) * m


def fcnet_kernel(x_ref, w1_ref, b1_ref, w2_ref, b2_ref, o_ref):
    # fc1: x @ W1 (MXU, bf16 inputs, f32 accumulation), bias + ReLU in f32 (VPU).
    h = jnp.dot(x_ref[...], w1_ref[...], preferred_element_type=jnp.float32)
    h = jnp.maximum(h + b1_ref[...], 0.0)
    # fc2: cast hidden back to the weight dtype so the MXU runs at full bf16 rate.
    out = jnp.dot(h.astype(w2_ref.dtype), w2_ref[...],
                  preferred_element_type=jnp.float32)
    o_ref[...] = (out + b2_ref[...]).astype(o_ref.dtype)


@functools.partial(jax.jit, static_argnames=("block_batch", "compute_dtype"))
def fcnet_forward(x, w1, b1, w2, b2, *, block_batch: int = 512,
                  compute_dtype=jnp.bfloat16):
    """FCNet forward: relu(x @ w1 + b1) @ w2 + b2.

    x:  [B, num_inputs]
    w1: [num_inputs, num_hidden]   (transposed vs. PyTorch nn.Linear.weight)
    b1: [num_hidden]
    w2: [num_hidden, num_outputs]  (transposed vs. PyTorch nn.Linear.weight)
    b2: [num_outputs]
    returns [B, num_outputs] in x.dtype
    """
    B, I = x.shape
    H = w1.shape[1]
    O = w2.shape[1]
    out_dtype = x.dtype

    # --- lane-dense zero padding of the feature axes ------------------------
    Ip = _round_up(I, _LANE)
    Hp = _round_up(H, _LANE)
    Op = _round_up(O, _LANE)

    # --- batch tiling --------------------------------------------------------
    # TB is a multiple of 8 (sublane) and, for large batches, 512 to amortize
    # per-step overhead / reach the HBM roofline. Batch is zero-padded to a
    # multiple of TB; padded rows are dropped at the end.
    TB = min(block_batch, _round_up(B, _SUBLANE))
    TB = _round_up(TB, _SUBLANE)
    Bp = _round_up(B, TB)
    n_tiles = Bp // TB

    # --- pad + cast inputs (zero padding is exact: relu(0)=0, 0*w=0) --------
    xp = jnp.pad(x, ((0, Bp - B), (0, Ip - I))).astype(compute_dtype)
    w1p = jnp.pad(w1, ((0, Ip - I), (0, Hp - H))).astype(compute_dtype)
    w2p = jnp.pad(w2, ((0, Hp - H), (0, Op - O))).astype(compute_dtype)
    b1p = jnp.pad(b1, (0, Hp - H)).reshape(1, Hp).astype(jnp.float32)
    b2p = jnp.pad(b2, (0, Op - O)).reshape(1, Op).astype(jnp.float32)

    out_padded = pl.pallas_call(
        fcnet_kernel,
        out_shape=jax.ShapeDtypeStruct((Bp, Op), out_dtype),
        grid=(n_tiles,),
        in_specs=[
            pl.BlockSpec((TB, Ip), lambda i: (i, 0)),   # x: tiled along batch
            pl.BlockSpec((Ip, Hp), lambda i: (0, 0)),   # W1: VMEM-resident
            pl.BlockSpec((1, Hp), lambda i: (0, 0)),    # b1: VMEM-resident
            pl.BlockSpec((Hp, Op), lambda i: (0, 0)),   # W2: VMEM-resident
            pl.BlockSpec((1, Op), lambda i: (0, 0)),    # b2: VMEM-resident
        ],
        out_specs=pl.BlockSpec((TB, Op), lambda i: (i, 0)),
        compiler_params=pltpu.CompilerParams(
            # Independent batch tiles -> megacore sharding on v7x (2 TCs).
            dimension_semantics=("parallel",),
        ),
    )(xp, w1p, b1p, w2p, b2p)

    # Slice off batch / output-lane padding.
    return out_padded[:B, :O]


def init_fcnet_params(key, num_inputs, num_hidden, num_outputs, dtype=jnp.float32):
    """torch.nn.Linear-style init U(-1/sqrt(fan_in), 1/sqrt(fan_in)), weights
    stored already transposed ([in, out]) for the kernel."""
    k1, k2, k3, k4 = jax.random.split(key, 4)
    bound1 = 1.0 / jnp.sqrt(num_inputs)
    bound2 = 1.0 / jnp.sqrt(num_hidden)
    w1 = jax.random.uniform(k1, (num_inputs, num_hidden), dtype, -bound1, bound1)
    b1 = jax.random.uniform(k2, (num_hidden,), dtype, -bound1, bound1)
    w2 = jax.random.uniform(k3, (num_hidden, num_outputs), dtype, -bound2, bound2)
    b2 = jax.random.uniform(k4, (num_outputs,), dtype, -bound2, bound2)
    return w1, b1, w2, b2


def _reference(x, w1, b1, w2, b2, compute_dtype):
    """Pure-JAX reference emulating the kernel's bf16-input / f32-accum math."""
    f32 = jnp.float32
    xc = x.astype(compute_dtype).astype(f32)
    w1c = w1.astype(compute_dtype).astype(f32)
    w2c = w2.astype(compute_dtype).astype(f32)
    h = jnp.maximum(xc @ w1c + b1.astype(f32), 0.0)
    h = h.astype(compute_dtype).astype(f32)
    return (h @ w2c + b2.astype(f32)).astype(x.dtype)


if __name__ == "__main__":
    # Small shapes consistent with FCNet(num_inputs, num_hidden, num_outputs).
    batch, num_inputs, num_hidden, num_outputs = 8, 32, 64, 16

    key = jax.random.PRNGKey(0)
    kx, kp = jax.random.split(key)
    x = jax.random.normal(kx, (batch, num_inputs), dtype=jnp.float32)
    w1, b1, w2, b2 = init_fcnet_params(kp, num_inputs, num_hidden, num_outputs)

    out = fcnet_forward(x, w1, b1, w2, b2)
    out = jax.block_until_ready(out)
    assert out.shape == (batch, num_outputs)

    ref = _reference(x, w1, b1, w2, b2, jnp.bfloat16)
    assert jnp.allclose(out, ref, atol=2e-3, rtol=2e-3), (
        f"max abs err {jnp.max(jnp.abs(out - ref))}")

    # Second check: larger, non-tile-aligned batch exercising batch tiling,
    # batch padding and the weight-resident index maps.
    kx2 = jax.random.fold_in(kx, 1)
    x2 = jax.random.normal(kx2, (600, num_inputs), dtype=jnp.float32)
    out2 = jax.block_until_ready(fcnet_forward(x2, w1, b1, w2, b2))
    ref2 = _reference(x2, w1, b1, w2, b2, jnp.bfloat16)
    assert out2.shape == (600, num_outputs)
    assert jnp.allclose(out2, ref2, atol=2e-3, rtol=2e-3), (
        f"max abs err {jnp.max(jnp.abs(out2 - ref2))}")

    print("KERNEL_OK")
</pallas_src>

<mosaic_0001>
module attributes {stable_mosaic.version = 11 : i64} {
  func.func @fcnet_kernel(%arg0: i32, %arg1: memref<8x128xbf16, #tpu.memory_space<vmem>>, %arg2: memref<128x128xbf16, #tpu.memory_space<vmem>>, %arg3: memref<1x128xf32, #tpu.memory_space<vmem>>, %arg4: memref<128x128xbf16, #tpu.memory_space<vmem>>, %arg5: memref<1x128xf32, #tpu.memory_space<vmem>>, %arg6: memref<8x128xf32, #tpu.memory_space<vmem>>) attributes {dimension_semantics = [#tpu.dimension_semantics<parallel>], iteration_bounds = array<i64: 1>, scalar_prefetch = 0 : i64, scratch_operands = 0 : i64, tpu.core_type = #tpu.core_type<tc>, window_params = [{transform_indices = @transform_0, window_bounds = array<i64: 8, 128>}, {pipeline_mode = #tpu.pipeline_mode<synchronous>, transform_indices = @transform_1, window_bounds = array<i64: 128, 128>}, {pipeline_mode = #tpu.pipeline_mode<synchronous>, transform_indices = @transform_2, window_bounds = array<i64: 1, 128>}, {pipeline_mode = #tpu.pipeline_mode<synchronous>, transform_indices = @transform_3, window_bounds = array<i64: 128, 128>}, {pipeline_mode = #tpu.pipeline_mode<synchronous>, transform_indices = @transform_4, window_bounds = array<i64: 1, 128>}, {transform_indices = @transform_5, window_bounds = array<i64: 8, 128>}]} {
    %c0 = arith.constant 0 : index
    %c0_0 = arith.constant 0 : index
    %0 = vector.load %arg1[%c0, %c0_0] : memref<8x128xbf16, #tpu.memory_space<vmem>>, vector<8x128xbf16>
    %c0_1 = arith.constant 0 : index
    %c0_2 = arith.constant 0 : index
    %1 = vector.load %arg2[%c0_1, %c0_2] : memref<128x128xbf16, #tpu.memory_space<vmem>>, vector<128x128xbf16>
    %cst = arith.constant dense<0.000000e+00> : vector<8x128xf32>
    %2 = tpu.matmul %0, %1, %cst {dimension_numbers = #tpu.dot_dimension_numbers<[1], [0], [0], [1], [0, 0, 1, 1], [], []>} : vector<8x128xbf16>, vector<128x128xbf16>, vector<8x128xf32> -> vector<8x128xf32>
    %c0_3 = arith.constant 0 : index
    %c0_4 = arith.constant 0 : index
    %3 = vector.load %arg3[%c0_3, %c0_4] : memref<1x128xf32, #tpu.memory_space<vmem>>, vector<1x128xf32>
    %4 = vector.broadcast %3 : vector<1x128xf32> to vector<8x128xf32>
    %5 = arith.addf %2, %4 : vector<8x128xf32>
    %cst_5 = arith.constant 0.000000e+00 : f32
    %6 = vector.broadcast %cst_5 : f32 to vector<8x128xf32>
    %7 = arith.maximumf %5, %6 : vector<8x128xf32>
    %8 = arith.truncf %7 : vector<8x128xf32> to vector<8x128xbf16>
    %c0_6 = arith.constant 0 : index
    %c0_7 = arith.constant 0 : index
    %9 = vector.load %arg4[%c0_6, %c0_7] : memref<128x128xbf16, #tpu.memory_space<vmem>>, vector<128x128xbf16>
    %cst_8 = arith.constant dense<0.000000e+00> : vector<8x128xf32>
    %10 = tpu.matmul %8, %9, %cst_8 {dimension_numbers = #tpu.dot_dimension_numbers<[1], [0], [0], [1], [0, 0, 1, 1], [], []>} : vector<8x128xbf16>, vector<128x128xbf16>, vector<8x128xf32> -> vector<8x128xf32>
    %c0_9 = arith.constant 0 : index
    %c0_10 = arith.constant 0 : index
    %11 = vector.load %arg5[%c0_9, %c0_10] : memref<1x128xf32, #tpu.memory_space<vmem>>, vector<1x128xf32>
    %12 = vector.broadcast %11 : vector<1x128xf32> to vector<8x128xf32>
    %13 = arith.addf %10, %12 : vector<8x128xf32>
    %c0_11 = arith.constant 0 : index
    %c0_12 = arith.constant 0 : index
    %14 = vector.load %arg6[%c0_11, %c0_12] : memref<8x128xf32, #tpu.memory_space<vmem>>, vector<8x128xf32>
    tpu.vector_store %arg6[%c0_11, %c0_12], %13 {strides = array<i32>} : memref<8x128xf32, #tpu.memory_space<vmem>>, vector<8x128xf32>,
    return
  }
  func.func @transform_0(%arg0: i32) -> (i32, i32) {
    %c0_i32 = arith.constant 0 : i32
    %c0_i32_0 = arith.constant 0 : i32
    return %arg0, %c0_i32 : i32, i32
  }
  func.func @transform_1(%arg0: i32) -> (i32, i32) {
    %c0_i32 = arith.constant 0 : i32
    %c0_i32_0 = arith.constant 0 : i32
    %c0_i32_1 = arith.constant 0 : i32
    return %c0_i32, %c0_i32_0 : i32, i32
  }
  func.func @transform_2(%arg0: i32) -> (i32, i32) {
    %c0_i32 = arith.constant 0 : i32
    %c0_i32_0 = arith.constant 0 : i32
    %c0_i32_1 = arith.constant 0 : i32
    return %c0_i32, %c0_i32_0 : i32, i32
  }
  func.func @transform_3(%arg0: i32) -> (i32, i32) {
    %c0_i32 = arith.constant 0 : i32
    %c0_i32_0 = arith.constant 0 : i32
    %c0_i32_1 = arith.constant 0 : i32
    return %c0_i32, %c0_i32_0 : i32, i32
  }
  func.func @transform_4(%arg0: i32) -> (i32, i32) {
    %c0_i32 = arith.constant 0 : i32
    %c0_i32_0 = arith.constant 0 : i32
    %c0_i32_1 = arith.constant 0 : i32
    return %c0_i32, %c0_i32_0 : i32, i32
  }
  func.func @transform_5(%arg0: i32) -> (i32, i32) {
    %c0_i32 = arith.constant 0 : i32
    %c0_i32_0 = arith.constant 0 : i32
    return %arg0, %c0_i32 : i32, i32
  }
}

</mosaic_0001>

<bundles_post_ra>
// kernel: fcnet_forward.1
= control target key start
LH: loop header
LB: loop body
LE: loop exit
PB: predicated region body
PF: predicated region fallthrough
CT: control target
= control target key end

     0   :  { %v381_v1 = vmov 0.0   ;;  %vm382_vm0 = vmmov 0   ;;  %s483_s0 = inlined_call_operand.vmem [shape: bf16[8,128], index: 0, kind: input, shape index: {}]   ;;  %s484_s1 = inlined_call_operand.vmem [shape: bf16[128,128], index: 1, kind: input, shape index: {}]   ;;  %s485_s2 = inlined_call_operand.vmem [shape: f32[1,128], index: 2, kind: input, shape index: {}]   ;;  %s486_s3 = inlined_call_operand.vmem [shape: bf16[128,128], index: 3, kind: input, shape index: {}]   ;;  %s487_s4 = inlined_call_operand.vmem [shape: f32[1,128], index: 4, kind: input, shape index: {}]   ;;  %s488_s5 = inlined_call_operand.hbm [shape: f32[8,128], index: 5, kind: output, shape index: {}]  }
   0x1   :  { %v341_v0 = vld [vmem:[%s484_s1] sm:$0xff]   ;;  %298 = vmatprep.subr.bf16.mxu0 %v381_v1  ;;  %318 = vmatprep.subr.bf16.mxu1 %v381_v1  ;;  %v342_v2 = vld [vmem:[%s484_s1 + $0x8] sm:$0xff]   ;;  %v343_v3 = vld [vmem:[%s484_s1 + $0x10] sm:$0xff]  }
   0x2   :  { %299 = vmatpush3.bf16.msra.mxu0 %v341_v0  ;;  %314 = vmatprep.mubr.msk.bf16.mxu0 %vm382_vm0, %v381_v1  ;;  %v349_v4 = vld [vmem:[%s486_s3] sm:$0xff]   ;;  %v344_v5 = vld [vmem:[%s484_s1 + $0x18] sm:$0xff]   ;;  %v350_v6 = vld [vmem:[%s486_s3 + $0x8] sm:$0xff]  }
   0x3   :  { %300 = vmatprep.subr.bf16.mxu0 %v381_v1  ;;  %334 = vmatprep.mubr.msk.bf16.mxu1 %vm382_vm0, %v381_v1  ;;  %v345_v7 = vld [vmem:[%s484_s1 + $0x20] sm:$0xff]   ;;  %v351_v8 = vld [vmem:[%s486_s3 + $0x10] sm:$0xff]  }
   0x4   :  { %319 = vmatpush3.bf16.msra.mxu1 %v349_v4 }
   0x5   :  { %320 = vmatprep.subr.bf16.mxu1 %v381_v1 }
   0x6   :  { %301 = vmatpush3.bf16.msra.mxu0 %v342_v2 }
   0x7   :  { %302 = vmatprep.subr.bf16.mxu0 %v381_v1 }
   0x8   :  { %321 = vmatpush3.bf16.msra.mxu1 %v350_v6 }
   0x9   :  { %322 = vmatprep.subr.bf16.mxu1 %v381_v1 }
   0xa   :  { %303 = vmatpush3.bf16.msra.mxu0 %v343_v3 }
   0xb   :  { %304 = vmatprep.subr.bf16.mxu0 %v381_v1 }
   0xe   :  { %305 = vmatpush3.bf16.msra.mxu0 %v344_v5 }
   0xf   :  { %306 = vmatprep.subr.bf16.mxu0 %v381_v1 }
  0x10   :  { %10 = vsyncpa [#allocation3], 0  ;;  %v346_v9 = vld [vmem:[%s484_s1 + $0x28] sm:$0xff]   ;;  %323 = vmatpush3.bf16.msra.mxu1 %v351_v8  ;;  %v352_v10 = vld [vmem:[%s486_s3 + $0x18] sm:$0xff]   ;;  %s383_s29 = smov [#allocation2]  }
  0x11   :  { %324 = vmatprep.subr.bf16.mxu1 %v381_v1  ;;  %v347_v11 = vld [vmem:[%s484_s1 + $0x30] sm:$0xff]   ;;  %v353_v12 = vld [vmem:[%s486_s3 + $0x20] sm:$0xff]   ;;  %v348_v13 = vld [vmem:[%s484_s1 + $0x38] sm:$0xff]   ;;  %s254_s30 = sshll.u32 %s383_s29, 4  ;;  %s255_s30 = int_to_ptr.vmem [resolvable:$true] %s254_s30 }
  0x12   :  { %307 = vmatpush3.bf16.msra.mxu0 %v345_v7  ;;  %v354_v14 = vld [vmem:[%s486_s3 + $0x28] sm:$0xff]   ;;  %v22_v15 = vld [vmem:[%s483_s0] sm:$0xf]  ;;  %v355_v16 = vld [vmem:[%s486_s3 + $0x30] sm:$0xff]   ;;  %p362_p1 = scmp.lt.s32.totalorder %s255_s30, %s255_s30 }
  0x13   :  { %308 = vmatprep.subr.bf16.mxu0 %v381_v1  ;;  %v356_v17 = vld [vmem:[%s486_s3 + $0x38] sm:$0xff]   ;;  %v262_v18 = vld [vmem:[%s485_s2] ss:$0 sm:$0xff]  ;;  %s357_s2 = scalar_lea.vmem %s255_s30, 128 }
  0x14   :  { %325 = vmatpush3.bf16.msra.mxu1 %v352_v10  ;;  %v271_v26 = vld [vmem:[%s487_s4] ss:$0 sm:$0xff]  ;;  %p358_p0 = scmp.ne.s32.totalorder %s255_s30, %s357_s2  ;;  %p363_p2 = scmp.lt.s32.totalorder %s357_s2, %s357_s2 }
  0x15   :  { %326 = vmatprep.subr.bf16.mxu1 %v381_v1 }
  0x16   :  { %309 = vmatpush3.bf16.msra.mxu0 %v346_v9  ;;  %p364_p3 = por %p363_p2, %p362_p1 }
  0x17   :  { %310 = vmatprep.subr.bf16.mxu0 %v381_v1 }
  0x18   :  { %327 = vmatpush3.bf16.msra.mxu1 %v353_v12  ;;  %p365_p4 = pnand %p364_p3, %p358_p0 }
  0x19   :  { %328 = vmatprep.subr.bf16.mxu1 %v381_v1 }
  0x1a   :  { %311 = vmatpush3.bf16.msra.mxu0 %v347_v11 }
  0x1b   :  { %312 = vmatprep.subr.bf16.mxu0 %v381_v1 }
  0x1c   :  { %329 = vmatpush3.bf16.msra.mxu1 %v354_v14 }
  0x1d   :  { %330 = vmatprep.subr.bf16.mxu1 %v381_v1 }
  0x1e   :  { %313 = vmatpush3.bf16.msra.mxu0 %v348_v13 }
  0x20   :  { %331 = vmatpush3.bf16.msra.mxu1 %v355_v16 }
  0x21   :  { %315 = vmatmul.mubr.bf16.vlgmr.msra.gmra.mrb[0].mxu0 %v22_v15  ;;  %332 = vmatprep.subr.bf16.mxu1 %v381_v1 }
  0x24   :  { %333 = vmatpush3.bf16.msra.mxu1 %v356_v17 }
  0xf4   :  { %v128_v19 = vpop.f32.mrb[0].mxu0 }
  0xf5   :  { %v129_v20 = vadd.f32 %v262_v18, %v128_v19  ;;  %v316_v21 = vpop.f32.mrb[1].mxu0 }
  0xf6   :  { %v131_v22 = vpop.f32.mrb[2].mxu0 }
  0xf7   :  { %v134_v23 = vmax.f32 %v129_v20, 0.0  ;;  %v317_v24 = vpop.f32.mrb[3].mxu0 }
  0xf9   :  { %v135_v25 = vpack.c.bf16 %v134_v23, %v134_v23 }
  0xfb   :  { %335 = vmatmul.mubr.bf16.vlgmr.msra.gmra.mrb[0].mxu1 %v135_v25 }
 0x1ce   :  { %v241_v27 = vpop.f32.mrb[0].mxu1 }
 0x1cf   :  { %v242_v28 = vadd.f32 %v271_v26, %v241_v27  ;;  %v336_v29 = vpop.f32.mrb[1].mxu1 }
 0x1d0   :  { %v244_v30 = vpop.f32.mrb[2].mxu1 }
 0x1d1   :  { %247 = vst [vmem:[#allocation2] sm:$0xff] %v242_v28  ;;  %v337_v31 = vpop.f32.mrb[3].mxu1 }
 0x1d2   :  { %368 = shalt.err (!%p365_p4)
}
 0x1d3   :  { %s369_s4 = scalar_lea.hbm %s488_s5, 128 }
 0x1d4   :  { %p370_p5 = scmp.ne.s32.totalorder %s488_s5, %s369_s4  ;;  %p373_p6 = scmp.lt.u32.totalorder %s369_s4, %s488_s5 }
 0x1d6   :  { %p375_p7 = pnand %p373_p6, %p370_p5 }
 0x1d8   :  { %378 = shalt.err (!%p375_p7)
}
 0x1d9   :  { %257 = dma.vmem_to_hbm [thread:$0]  %s255_s30, 128, %s488_s5, [#allocation3]  }
 0x1da   :  { %379 = dma.done.wait [#allocation3], 128  }
 0x1db   :  { %380 = vsyncadd [#allocation3], 4294967168 }
 0x1dc   :  { %261 = vsyncpa [#allocation3], 1 }

</bundles_post_ra>
